<compile_context>
chip_gen: v7x
topology: tpu7x:2x2x1
jax: 0.10.0
libtpu: 0.0.40
codegen_flags: <defaults>
</compile_context>

<pallas_src>
import jax
import jax.numpy as jnp
from jax.experimental import pallas as pl
from jax.experimental.pallas import tpu as pltpu


def _elementwise_kernel(a_ref, b_ref,
                        add_ref, sub_ref, mul_ref, div_ref, gt_ref, lt_ref):
    a = a_ref[...]
    b = b_ref[...]
    add_ref[...] = a + b
    sub_ref[...] = a - b
    mul_ref[...] = a * b
    div_ref[...] = a / (b + 1e-5)
    # .astype is a no-op when the output dtype is bool; it also makes the same
    # kernel body work for the int8 fallback path.
    gt_ref[...] = (a > b).astype(gt_ref.dtype)
    lt_ref[...] = (a < b).astype(lt_ref.dtype)


def _round_up(x, m):
    return ((x + m - 1) // m) * m


def _build_call(rows, lanes, tr, grid, dtype, mask_dtype):
    spec = pl.BlockSpec((tr, lanes), lambda i: (i, 0))
    f32_out = jax.ShapeDtypeStruct((rows, lanes), dtype)
    mask_out = jax.ShapeDtypeStruct((rows, lanes), mask_dtype)
    n = rows * lanes
    # ~26 B/elem of HBM traffic: 8 B reads + 16 B f32 writes + 2 B mask writes.
    cost = pl.CostEstimate(flops=8 * n, transcendentals=0,
                           bytes_accessed=26 * n)
    return pl.pallas_call(
        _elementwise_kernel,
        out_shape=(f32_out, f32_out, f32_out, f32_out, mask_out, mask_out),
        grid_spec=pltpu.PrefetchScalarGridSpec(
            num_scalar_prefetch=0,
            grid=grid,
            in_specs=[spec, spec],
            out_specs=[spec, spec, spec, spec, spec, spec],
        ),
        compiler_params=pltpu.CompilerParams(
            dimension_semantics=("parallel",),
            vmem_limit_bytes=32 * 1024 * 1024,
        ),
        cost_estimate=cost,
    )


def pt_module_forward(x0, x1, *, tile_rows=2048, lanes=128):
    """Pallas equivalent of PtModule.forward([x0, x1]) -> dict of results."""
    assert x0.shape == x1.shape and x0.dtype == x1.dtype
    orig_shape = x0.shape
    n = x0.size
    assert n % lanes == 0, "total element count must be a multiple of 128"
    rows = n // lanes

    # Tile selection:
    #  * full-extent block when the array is tiny (always a legal tiling),
    #  * otherwise a multiple-of-32 tile chosen so the grid has >=2 steps
    #    (lets the "parallel" axis shard across both v7x TensorCores),
    #    capped at tile_rows (13.6 MiB double-buffered across the 8 streams
    #    at the default 2048 -- fits the 32 MiB VMEM limit set below).
    if rows <= 32:
        tr = rows
    else:
        tr = min(tile_rows, _round_up(pl.cdiv(rows, 2), 32))
        tr = min(tr, rows)
    grid = (pl.cdiv(rows, tr),)

    a2 = x0.reshape(rows, lanes)   # lane-dense 2-D slab, no padding copies
    b2 = x1.reshape(rows, lanes)

    try:
        # Preferred path: bool masks written directly from the kernel.
        add2, sub2, mul2, div2, gt2, lt2 = _build_call(
            rows, lanes, tr, grid, x0.dtype, jnp.bool_)(a2, b2)
    except Exception:
        # Fallback if Mosaic rejects i1 stores for this tiling: int8 masks in
        # the kernel, cheap cast outside.
        add2, sub2, mul2, div2, gt2, lt2 = _build_call(
            rows, lanes, tr, grid, x0.dtype, jnp.int8)(a2, b2)
        gt2 = gt2.astype(jnp.bool_)
        lt2 = lt2.astype(jnp.bool_)

    def unflat(y):
        return y.reshape(orig_shape)

    return {
        "add": unflat(add2),
        "subtract": unflat(sub2),
        "multiply": unflat(mul2),
        "divide": unflat(div2),
        "greater_than": unflat(gt2),
        "less_than": unflat(lt2),
    }


if __name__ == "__main__":
    key = jax.random.PRNGKey(0)
    k0, k1 = jax.random.split(key)
    # small NCHW shapes: batch=2, channels=4, spatial=16x16
    x0 = jax.random.normal(k0, (2, 4, 16, 16), dtype=jnp.float32)
    x1 = jax.random.normal(k1, (2, 4, 16, 16), dtype=jnp.float32)

    out = pt_module_forward(x0, x1)
    jax.block_until_ready(out)

    # quick correctness check against plain JAX reference (mirrors PtModule)
    ref = {
        "add": x0 + x1,
        "subtract": x0 - x1,
        "multiply": x0 * x1,
        "divide": x0 / (x1 + 1e-5),
        "greater_than": x0 > x1,
        "less_than": x0 < x1,
    }
    for name, r in ref.items():
        got = out[name]
        assert got.shape == r.shape and got.dtype == r.dtype, name
        if r.dtype == jnp.bool_:
            assert bool(jnp.all(got == r)), name
        else:
            assert bool(jnp.allclose(got, r, rtol=1e-6, atol=1e-6)), name

    print("KERNEL_OK")
</pallas_src>

<mosaic_0001>
module attributes {stable_mosaic.version = 11 : i64} {
  func.func @_elementwise_kernel(%arg0: i32, %arg1: memref<16x128xf32, #tpu.memory_space<vmem>>, %arg2: memref<16x128xf32, #tpu.memory_space<vmem>>, %arg3: memref<16x128xf32, #tpu.memory_space<vmem>>, %arg4: memref<16x128xf32, #tpu.memory_space<vmem>>, %arg5: memref<16x128xf32, #tpu.memory_space<vmem>>, %arg6: memref<16x128xf32, #tpu.memory_space<vmem>>, %arg7: memref<16x128xi32, #tpu.memory_space<vmem>>, %arg8: memref<16x128xi32, #tpu.memory_space<vmem>>) attributes {dimension_semantics = [#tpu.dimension_semantics<parallel>], iteration_bounds = array<i64: 1>, scalar_prefetch = 0 : i64, scratch_operands = 0 : i64, tpu.core_type = #tpu.core_type<tc>, window_params = [{transform_indices = @transform_0, window_bounds = array<i64: 16, 128>}, {transform_indices = @transform_1, window_bounds = array<i64: 16, 128>}, {transform_indices = @transform_2, window_bounds = array<i64: 16, 128>}, {transform_indices = @transform_3, window_bounds = array<i64: 16, 128>}, {transform_indices = @transform_4, window_bounds = array<i64: 16, 128>}, {transform_indices = @transform_5, window_bounds = array<i64: 16, 128>}, {transform_indices = @transform_6, window_bounds = array<i64: 16, 128>}, {transform_indices = @transform_7, window_bounds = array<i64: 16, 128>}]} {
    %c0 = arith.constant 0 : index
    %c0_0 = arith.constant 0 : index
    %0 = vector.load %arg1[%c0, %c0_0] : memref<16x128xf32, #tpu.memory_space<vmem>>, vector<16x128xf32>
    %c0_1 = arith.constant 0 : index
    %c0_2 = arith.constant 0 : index
    %1 = vector.load %arg2[%c0_1, %c0_2] : memref<16x128xf32, #tpu.memory_space<vmem>>, vector<16x128xf32>
    %2 = arith.addf %0, %1 : vector<16x128xf32>
    %c0_3 = arith.constant 0 : index
    %c0_4 = arith.constant 0 : index
    %3 = vector.load %arg3[%c0_3, %c0_4] : memref<16x128xf32, #tpu.memory_space<vmem>>, vector<16x128xf32>
    tpu.vector_store %arg3[%c0_3, %c0_4], %2 {strides = array<i32>} : memref<16x128xf32, #tpu.memory_space<vmem>>, vector<16x128xf32>,
    %4 = arith.subf %0, %1 : vector<16x128xf32>
    %c0_5 = arith.constant 0 : index
    %c0_6 = arith.constant 0 : index
    %5 = vector.load %arg4[%c0_5, %c0_6] : memref<16x128xf32, #tpu.memory_space<vmem>>, vector<16x128xf32>
    tpu.vector_store %arg4[%c0_5, %c0_6], %4 {strides = array<i32>} : memref<16x128xf32, #tpu.memory_space<vmem>>, vector<16x128xf32>,
    %6 = arith.mulf %0, %1 : vector<16x128xf32>
    %c0_7 = arith.constant 0 : index
    %c0_8 = arith.constant 0 : index
    %7 = vector.load %arg5[%c0_7, %c0_8] : memref<16x128xf32, #tpu.memory_space<vmem>>, vector<16x128xf32>
    tpu.vector_store %arg5[%c0_7, %c0_8], %6 {strides = array<i32>} : memref<16x128xf32, #tpu.memory_space<vmem>>, vector<16x128xf32>,
    %cst = arith.constant 9.99999974E-6 : f32
    %8 = vector.broadcast %cst : f32 to vector<16x128xf32>
    %9 = arith.addf %1, %8 : vector<16x128xf32>
    %10 = arith.divf %0, %9 : vector<16x128xf32>
    %c0_9 = arith.constant 0 : index
    %c0_10 = arith.constant 0 : index
    %11 = vector.load %arg6[%c0_9, %c0_10] : memref<16x128xf32, #tpu.memory_space<vmem>>, vector<16x128xf32>
    tpu.vector_store %arg6[%c0_9, %c0_10], %10 {strides = array<i32>} : memref<16x128xf32, #tpu.memory_space<vmem>>, vector<16x128xf32>,
    %12 = arith.cmpf ogt, %0, %1 : vector<16x128xf32>
    %c0_11 = arith.constant 0 : index
    %c0_12 = arith.constant 0 : index
    %13 = vector.load %arg7[%c0_11, %c0_12] : memref<16x128xi32, #tpu.memory_space<vmem>>, vector<16x128xi32>
    %14 = arith.extui %12 : vector<16x128xi1> to vector<16x128xi32>
    %cst_13 = arith.constant dense<0> : vector<16x128xi32>
    %15 = arith.cmpi ne, %13, %cst_13 : vector<16x128xi32>
    tpu.vector_store %arg7[%c0_11, %c0_12], %14 {strides = array<i32>} : memref<16x128xi32, #tpu.memory_space<vmem>>, vector<16x128xi32>,
    %16 = arith.cmpf olt, %0, %1 : vector<16x128xf32>
    %c0_14 = arith.constant 0 : index
    %c0_15 = arith.constant 0 : index
    %17 = vector.load %arg8[%c0_14, %c0_15] : memref<16x128xi32, #tpu.memory_space<vmem>>, vector<16x128xi32>
    %18 = arith.extui %16 : vector<16x128xi1> to vector<16x128xi32>
    %cst_16 = arith.constant dense<0> : vector<16x128xi32>
    %19 = arith.cmpi ne, %17, %cst_16 : vector<16x128xi32>
    tpu.vector_store %arg8[%c0_14, %c0_15], %18 {strides = array<i32>} : memref<16x128xi32, #tpu.memory_space<vmem>>, vector<16x128xi32>,
    return
  }
  func.func @transform_0(%arg0: i32) -> (i32, i32) {
    %c0_i32 = arith.constant 0 : i32
    %c0_i32_0 = arith.constant 0 : i32
    return %arg0, %c0_i32 : i32, i32
  }
  func.func @transform_1(%arg0: i32) -> (i32, i32) {
    %c0_i32 = arith.constant 0 : i32
    %c0_i32_0 = arith.constant 0 : i32
    return %arg0, %c0_i32 : i32, i32
  }
  func.func @transform_2(%arg0: i32) -> (i32, i32) {
    %c0_i32 = arith.constant 0 : i32
    %c0_i32_0 = arith.constant 0 : i32
    return %arg0, %c0_i32 : i32, i32
  }
  func.func @transform_3(%arg0: i32) -> (i32, i32) {
    %c0_i32 = arith.constant 0 : i32
    %c0_i32_0 = arith.constant 0 : i32
    return %arg0, %c0_i32 : i32, i32
  }
  func.func @transform_4(%arg0: i32) -> (i32, i32) {
    %c0_i32 = arith.constant 0 : i32
    %c0_i32_0 = arith.constant 0 : i32
    return %arg0, %c0_i32 : i32, i32
  }
  func.func @transform_5(%arg0: i32) -> (i32, i32) {
    %c0_i32 = arith.constant 0 : i32
    %c0_i32_0 = arith.constant 0 : i32
    return %arg0, %c0_i32 : i32, i32
  }
  func.func @transform_6(%arg0: i32) -> (i32, i32) {
    %c0_i32 = arith.constant 0 : i32
    %c0_i32_0 = arith.constant 0 : i32
    return %arg0, %c0_i32 : i32, i32
  }
  func.func @transform_7(%arg0: i32) -> (i32, i32) {
    %c0_i32 = arith.constant 0 : i32
    %c0_i32_0 = arith.constant 0 : i32
    return %arg0, %c0_i32 : i32, i32
  }
}

module attributes {stable_mosaic.version = 11 : i64} {
  func.func @_elementwise_kernel(%arg0: i32, %arg1: memref<16x128xf32, #tpu.memory_space<vmem>>, %arg2: memref<16x128xf32, #tpu.memory_space<vmem>>, %arg3: memref<16x128xf32, #tpu.memory_space<vmem>>, %arg4: memref<16x128xf32, #tpu.memory_space<vmem>>, %arg5: memref<16x128xf32, #tpu.memory_space<vmem>>, %arg6: memref<16x128xf32, #tpu.memory_space<vmem>>, %arg7: memref<16x128xi8, #tpu.memory_space<vmem>>, %arg8: memref<16x128xi8, #tpu.memory_space<vmem>>) attributes {dimension_semantics = [#tpu.dimension_semantics<parallel>], iteration_bounds = array<i64: 1>, scalar_prefetch = 0 : i64, scratch_operands = 0 : i64, tpu.core_type = #tpu.core_type<tc>, window_params = [{transform_indices = @transform_0, window_bounds = array<i64: 16, 128>}, {transform_indices = @transform_1, window_bounds = array<i64: 16, 128>}, {transform_indices = @transform_2, window_bounds = array<i64: 16, 128>}, {transform_indices = @transform_3, window_bounds = array<i64: 16, 128>}, {transform_indices = @transform_4, window_bounds = array<i64: 16, 128>}, {transform_indices = @transform_5, window_bounds = array<i64: 16, 128>}, {transform_indices = @transform_6, window_bounds = array<i64: 16, 128>}, {transform_indices = @transform_7, window_bounds = array<i64: 16, 128>}]} {
    %c0 = arith.constant 0 : index
    %c0_0 = arith.constant 0 : index
    %0 = vector.load %arg1[%c0, %c0_0] : memref<16x128xf32, #tpu.memory_space<vmem>>, vector<16x128xf32>
    %c0_1 = arith.constant 0 : index
    %c0_2 = arith.constant 0 : index
    %1 = vector.load %arg2[%c0_1, %c0_2] : memref<16x128xf32, #tpu.memory_space<vmem>>, vector<16x128xf32>
    %2 = arith.addf %0, %1 : vector<16x128xf32>
    %c0_3 = arith.constant 0 : index
    %c0_4 = arith.constant 0 : index
    %3 = vector.load %arg3[%c0_3, %c0_4] : memref<16x128xf32, #tpu.memory_space<vmem>>, vector<16x128xf32>
    tpu.vector_store %arg3[%c0_3, %c0_4], %2 {strides = array<i32>} : memref<16x128xf32, #tpu.memory_space<vmem>>, vector<16x128xf32>,
    %4 = arith.subf %0, %1 : vector<16x128xf32>
    %c0_5 = arith.constant 0 : index
    %c0_6 = arith.constant 0 : index
    %5 = vector.load %arg4[%c0_5, %c0_6] : memref<16x128xf32, #tpu.memory_space<vmem>>, vector<16x128xf32>
    tpu.vector_store %arg4[%c0_5, %c0_6], %4 {strides = array<i32>} : memref<16x128xf32, #tpu.memory_space<vmem>>, vector<16x128xf32>,
    %6 = arith.mulf %0, %1 : vector<16x128xf32>
    %c0_7 = arith.constant 0 : index
    %c0_8 = arith.constant 0 : index
    %7 = vector.load %arg5[%c0_7, %c0_8] : memref<16x128xf32, #tpu.memory_space<vmem>>, vector<16x128xf32>
    tpu.vector_store %arg5[%c0_7, %c0_8], %6 {strides = array<i32>} : memref<16x128xf32, #tpu.memory_space<vmem>>, vector<16x128xf32>,
    %cst = arith.constant 9.99999974E-6 : f32
    %8 = vector.broadcast %cst : f32 to vector<16x128xf32>
    %9 = arith.addf %1, %8 : vector<16x128xf32>
    %10 = arith.divf %0, %9 : vector<16x128xf32>
    %c0_9 = arith.constant 0 : index
    %c0_10 = arith.constant 0 : index
    %11 = vector.load %arg6[%c0_9, %c0_10] : memref<16x128xf32, #tpu.memory_space<vmem>>, vector<16x128xf32>
    tpu.vector_store %arg6[%c0_9, %c0_10], %10 {strides = array<i32>} : memref<16x128xf32, #tpu.memory_space<vmem>>, vector<16x128xf32>,
    %12 = arith.cmpf ogt, %0, %1 : vector<16x128xf32>
    %13 = arith.extui %12 : vector<16x128xi1> to vector<16x128xi8>
    %c0_11 = arith.constant 0 : index
    %c0_12 = arith.constant 0 : index
    %14 = vector.load %arg7[%c0_11, %c0_12] : memref<16x128xi8, #tpu.memory_space<vmem>>, vector<16x128xi8>
    tpu.vector_store %arg7[%c0_11, %c0_12], %13 {strides = array<i32>} : memref<16x128xi8, #tpu.memory_space<vmem>>, vector<16x128xi8>,
    %15 = arith.cmpf olt, %0, %1 : vector<16x128xf32>
    %16 = arith.extui %15 : vector<16x128xi1> to vector<16x128xi8>
    %c0_13 = arith.constant 0 : index
    %c0_14 = arith.constant 0 : index
    %17 = vector.load %arg8[%c0_13, %c0_14] : memref<16x128xi8, #tpu.memory_space<vmem>>, vector<16x128xi8>
    tpu.vector_store %arg8[%c0_13, %c0_14], %16 {strides = array<i32>} : memref<16x128xi8, #tpu.memory_space<vmem>>, vector<16x128xi8>,
    return
  }
  func.func @transform_0(%arg0: i32) -> (i32, i32) {
    %c0_i32 = arith.constant 0 : i32
    %c0_i32_0 = arith.constant 0 : i32
    return %arg0, %c0_i32 : i32, i32
  }
  func.func @transform_1(%arg0: i32) -> (i32, i32) {
    %c0_i32 = arith.constant 0 : i32
    %c0_i32_0 = arith.constant 0 : i32
    return %arg0, %c0_i32 : i32, i32
  }
  func.func @transform_2(%arg0: i32) -> (i32, i32) {
    %c0_i32 = arith.constant 0 : i32
    %c0_i32_0 = arith.constant 0 : i32
    return %arg0, %c0_i32 : i32, i32
  }
  func.func @transform_3(%arg0: i32) -> (i32, i32) {
    %c0_i32 = arith.constant 0 : i32
    %c0_i32_0 = arith.constant 0 : i32
    return %arg0, %c0_i32 : i32, i32
  }
  func.func @transform_4(%arg0: i32) -> (i32, i32) {
    %c0_i32 = arith.constant 0 : i32
    %c0_i32_0 = arith.constant 0 : i32
    return %arg0, %c0_i32 : i32, i32
  }
  func.func @transform_5(%arg0: i32) -> (i32, i32) {
    %c0_i32 = arith.constant 0 : i32
    %c0_i32_0 = arith.constant 0 : i32
    return %arg0, %c0_i32 : i32, i32
  }
  func.func @transform_6(%arg0: i32) -> (i32, i32) {
    %c0_i32 = arith.constant 0 : i32
    %c0_i32_0 = arith.constant 0 : i32
    return %arg0, %c0_i32 : i32, i32
  }
  func.func @transform_7(%arg0: i32) -> (i32, i32) {
    %c0_i32 = arith.constant 0 : i32
    %c0_i32_0 = arith.constant 0 : i32
    return %arg0, %c0_i32 : i32, i32
  }
}

</mosaic_0001>

<bundles_post_ra>
// kernel: tpu_custom_call.1
= control target key start
LH: loop header
LB: loop body
LE: loop exit
PB: predicated region body
PF: predicated region fallthrough
CT: control target
= control target key end

     0   :  { %13 = vsyncpa [#allocation3], 0  ;;  %s500_s0 = inlined_call_operand.hbm [shape: f32[16,128], index: 0, kind: input, shape index: {}]   ;;  %s501_s1 = inlined_call_operand.hbm [shape: f32[16,128], index: 1, kind: input, shape index: {}]   ;;  %s502_s2 = inlined_call_operand.hbm [shape: f32[16,128], index: 2, kind: output, shape index: {0}]   ;;  %s503_s3 = inlined_call_operand.hbm [shape: f32[16,128], index: 3, kind: output, shape index: {1}]   ;;  %s504_s4 = inlined_call_operand.hbm [shape: f32[16,128], index: 4, kind: output, shape index: {2}]   ;;  %s505_s5 = inlined_call_operand.hbm [shape: f32[16,128], index: 5, kind: output, shape index: {3}]   ;;  %s506_s6 = inlined_call_operand.vmem [shape: s32[16,128], index: 6, kind: output, shape index: {4}]   ;;  %s507_s7 = inlined_call_operand.vmem [shape: s32[16,128], index: 7, kind: output, shape index: {5}]  }
   0x1   :  { %14 = vsyncpa [#allocation6], 0 }
   0x2   :  { %15 = vsyncpa [#allocation4], 0 }
   0x3   :  { %16 = vsyncpa [#allocation9], 0 }
   0x4   :  { %17 = vsyncpa [#allocation12], 0  ;;  %s312_s24 = smov [#allocation2]   ;;  %s170_s28 = scalar_lea.hbm %s500_s0, 256 }
   0x5   :  { %s23_s25 = sshll.u32 %s312_s24, 4  ;;  %p171_p0 = scmp.ne.s32.totalorder %s500_s0, %s170_s28  ;;  %s24_s25 = int_to_ptr.vmem [resolvable:$true] %s23_s25 }
   0x6   :  { %p174_p1 = scmp.lt.u32.totalorder %s170_s28, %s500_s0 }
   0x8   :  { %p176_p2 = pnand %p174_p1, %p171_p0 }
   0xa   :  { %179 = shalt.err (!%p176_p2)
}
   0xb   :  { %s180_s10 = scalar_lea.vmem %s24_s25, 256  ;;  %p185_p4 = scmp.lt.s32.totalorder %s24_s25, %s24_s25 }
   0xc   :  { %p181_p3 = scmp.ne.s32.totalorder %s24_s25, %s180_s10  ;;  %p186_p5 = scmp.lt.s32.totalorder %s180_s10, %s180_s10 }
   0xe   :  { %p187_p6 = por %p186_p5, %p185_p4 }
  0x10   :  { %p188_p7 = pnand %p187_p6, %p181_p3 }
  0x12   :  { %191 = shalt.err (!%p188_p7)
}
  0x13   :  { %s313_s11 = smov 128   ;;  %s314_s12 = smov 8  }
  0x14   :  { %29 = dma.hbm_to_vmem [thread:$0]  %s500_s0, 256, %s24_s25, [#allocation3], %s313_s11, %s313_s11, %s314_s12  }
  0x15   :  { %s315_s15 = smov [#allocation5]   ;;  %s192_s19 = scalar_lea.hbm %s501_s1, 256 }
  0x16   :  { %s35_s16 = sshll.u32 %s315_s15, 4  ;;  %p193_p8 = scmp.ne.s32.totalorder %s501_s1, %s192_s19  ;;  %s36_s16 = int_to_ptr.vmem [resolvable:$true] %s35_s16 }
  0x17   :  { %p196_p9 = scmp.lt.u32.totalorder %s192_s19, %s501_s1 }
  0x19   :  { %p198_p10 = pnand %p196_p9, %p193_p8 }
  0x1b   :  { %201 = shalt.err (!%p198_p10)
}
  0x1c   :  { %s202_s24 = scalar_lea.vmem %s36_s16, 256  ;;  %p207_p12 = scmp.lt.s32.totalorder %s36_s16, %s36_s16 }
  0x1d   :  { %p203_p11 = scmp.ne.s32.totalorder %s36_s16, %s202_s24  ;;  %p208_p13 = scmp.lt.s32.totalorder %s202_s24, %s202_s24 }
  0x1f   :  { %p209_p0 = por %p208_p13, %p207_p12 }
  0x21   :  { %p210_p1 = pnand %p209_p0, %p203_p11 }
  0x23   :  { %213 = shalt.err (!%p210_p1)
}
  0x24   :  { %41 = dma.hbm_to_vmem [thread:$0]  %s501_s1, 256, %s36_s16, [#allocation6], %s313_s11, %s313_s11, %s314_s12  }
  0x25   :  { %302 = dma.done.wait [#allocation3], 256  }
  0x26   :  { %303 = vsyncadd [#allocation3], 4294967040 }
  0x27   :  { %304 = dma.done.wait [#allocation6], 256  }
  0x28   :  { %305 = vsyncadd [#allocation6], 4294967040  ;;  %s316_s26 = smov [#allocation8]   ;;  %v391_v0 = vld [vmem:[#allocation2] sm:$0xff]  ;;  %v50_v1 = vld [vmem:[#allocation5] sm:$0xff]  ;;  %s317_s28 = smov [#allocation7]  }
  0x29   :  { %s101_s27 = sshll.u32 %s316_s26, 4  ;;  %v393_v2 = vld [vmem:[#allocation2 + $0x8] sm:$0xff]  ;;  %s89_s29 = sshll.u32 %s317_s28, 4  ;;  %v56_v3 = vsub.f32 %v391_v0, %v50_v1  ;;  %v51_v4 = vld [vmem:[#allocation5 + $0x8] sm:$0xff]  ;;  %v52_v5 = vadd.f32 %v50_v1, %v391_v0  ;;  %v60_v6 = vmul.f32 %v50_v1, %v391_v0  ;;  %v64_v7 = vadd.f32 1e-05, %v50_v1  ;;  %s401_s27 = int_to_ptr.vmem [resolvable:$true] %s101_s27  ;;  %s406_s29 = int_to_ptr.vmem [resolvable:$true] %s89_s29 }
  0x2a   :  { %s318_s1 = smov [#allocation10]   ;;  %v57_v8 = vsub.f32 %v393_v2, %v51_v4  ;;  %v53_v9 = vadd.f32 %v51_v4, %v393_v2  ;;  %v61_v10 = vmul.f32 %v51_v4, %v393_v2  ;;  %v65_v11 = vadd.f32 1e-05, %v51_v4  ;;  %s214_s8 = scalar_lea.vmem %s401_s27, 256 }
  0x2b   :  { %s113_s30 = sshll.u32 %s318_s1, 4  ;;  %58 = vst [vmem:[#allocation8] sm:$0xff] %v56_v3  ;;  %54 = vst [vmem:[#allocation7] sm:$0xff] %v52_v5  ;;  %166 = vrcp.f32 %v64_v7  ;;  %vm72_vm0 = vcmp.gt.f32.partialorder %v391_v0, %v50_v1  ;;  %vm73_vm1 = vcmp.gt.f32.partialorder %v393_v2, %v51_v4  ;;  %vm78_vm2 = vcmp.lt.f32.partialorder %v391_v0, %v50_v1  ;;  %p215_p2 = scmp.ne.s32.totalorder %s401_s27, %s214_s8  ;;  %s408_s30 = int_to_ptr.vmem [resolvable:$true] %s113_s30 }
  0x2c   :  { %62 = vst [vmem:[#allocation10] sm:$0xff] %v60_v6  ;;  %59 = vst [vmem:[#allocation8 + $0x8] sm:$0xff] %v57_v8  ;;  %168 = vrcp.f32 %v65_v11  ;;  %v319_v12 = vmov 0   ;;  %p219_p3 = scmp.lt.s32.totalorder %s401_s27, %s401_s27  ;;  %p220_p4 = scmp.lt.s32.totalorder %s214_s8, %s214_s8 }
  0x2d   :  { %55 = vst [vmem:[#allocation7 + $0x8] sm:$0xff] %v53_v9  ;;  %63 = vst [vmem:[#allocation10 + $0x8] sm:$0xff] %v61_v10  ;;  %v74_v13 = vsel %vm72_vm0, 1, %v319_v12  ;;  %v75_v14 = vsel %vm73_vm1, 1, %v319_v12  ;;  %v80_v15 = vsel %vm78_vm2, 1, %v319_v12 }
  0x2e   :  { %p221_p5 = por %p220_p4, %p219_p3 }
  0x30   :  { %p222_p6 = pnand %p221_p5, %p215_p2 }
  0x32   :  { %225 = shalt.err (!%p222_p6)
}
  0x33   :  { %s226_s13 = scalar_lea.hbm %s503_s3, 256 }
  0x34   :  { %p227_p7 = scmp.ne.s32.totalorder %s503_s3, %s226_s13  ;;  %p230_p8 = scmp.lt.u32.totalorder %s226_s13, %s503_s3 }
  0x36   :  { %p232_p9 = pnand %p230_p8, %p227_p7 }
  0x38   :  { %235 = shalt.err (!%p232_p9)
}
  0x39   :  { %107 = dma.vmem_to_hbm [thread:$0]  %s401_s27, 256, %s503_s3, [#allocation9], %s313_s11, %s313_s11, %s314_s12   ;;  %vm79_vm3 = vcmp.lt.f32.partialorder %v393_v2, %v51_v4 }
  0x3a   :  { %76 = vst [vmem:[%s506_s6] sm:$0xff] %v74_v13  ;;  %77 = vst [vmem:[%s506_s6 + $0x8] sm:$0xff] %v75_v14  ;;  %v81_v16 = vsel %vm79_vm3, 1, %v319_v12  ;;  %s236_s25 = scalar_lea.vmem %s406_s29, 256  ;;  %p241_p11 = scmp.lt.s32.totalorder %s406_s29, %s406_s29 }
  0x3b   :  { %82 = vst [vmem:[%s507_s7] sm:$0xff] %v80_v15  ;;  %p237_p10 = scmp.ne.s32.totalorder %s406_s29, %s236_s25  ;;  %p242_p12 = scmp.lt.s32.totalorder %s236_s25, %s236_s25 }
  0x3d   :  { %p243_p13 = por %p242_p12, %p241_p11 }
  0x3f   :  { %p244_p0 = pnand %p243_p13, %p237_p10 }
  0x41   :  { %247 = shalt.err (!%p244_p0)
}
  0x42   :  { %s248_s27 = scalar_lea.hbm %s502_s2, 256 }
  0x43   :  { %p249_p1 = scmp.ne.s32.totalorder %s502_s2, %s248_s27  ;;  %p252_p2 = scmp.lt.u32.totalorder %s248_s27, %s502_s2 }
  0x45   :  { %p254_p3 = pnand %p252_p2, %p249_p1 }
  0x47   :  { %257 = shalt.err (!%p254_p3)
}
  0x48   :  { %95 = dma.vmem_to_hbm [thread:$0]  %s406_s29, 256, %s502_s2, [#allocation4], %s313_s11, %s313_s11, %s314_s12  }
  0x49   :  { %83 = vst [vmem:[%s507_s7 + $0x8] sm:$0xff] %v81_v16  ;;  %s258_s15 = scalar_lea.vmem %s408_s30, 256  ;;  %p263_p5 = scmp.lt.s32.totalorder %s408_s30, %s408_s30 }
  0x4a   :  { %p259_p4 = scmp.ne.s32.totalorder %s408_s30, %s258_s15  ;;  %p264_p6 = scmp.lt.s32.totalorder %s258_s15, %s258_s15 }
  0x4c   :  { %p265_p7 = por %p264_p6, %p263_p5 }
  0x4e   :  { %p266_p8 = pnand %p265_p7, %p259_p4 }
  0x50   :  { %269 = shalt.err (!%p266_p8)
}
  0x51   :  { %s270_s18 = scalar_lea.hbm %s504_s4, 256 }
  0x52   :  { %p271_p9 = scmp.ne.s32.totalorder %s504_s4, %s270_s18  ;;  %p274_p10 = scmp.lt.u32.totalorder %s270_s18, %s504_s4 }
  0x54   :  { %p276_p11 = pnand %p274_p10, %p271_p9 }
  0x56   :  { %279 = shalt.err (!%p276_p11)
}
  0x57   :  { %119 = dma.vmem_to_hbm [thread:$0]  %s408_s30, 256, %s504_s4, [#allocation9], %s313_s11, %s313_s11, %s314_s12   ;;  %v167_v17 = vpop.eup %166 }
  0x58   :  { %s320_s22 = smov [#allocation11]   ;;  %v169_v18 = vpop.eup %168  ;;  %v67_v19 = vmul.f32 %v167_v17, %v391_v0 }
  0x59   :  { %s125_s23 = sshll.u32 %s320_s22, 4  ;;  %v69_v20 = vmul.f32 %v169_v18, %v393_v2  ;;  %s126_s23 = int_to_ptr.vmem [resolvable:$true] %s125_s23 }
  0x5a   :  { %70 = vst [vmem:[#allocation11] sm:$0xff] %v67_v19  ;;  %s280_s24 = scalar_lea.vmem %s126_s23, 256  ;;  %p285_p13 = scmp.lt.s32.totalorder %s126_s23, %s126_s23 }
  0x5b   :  { %71 = vst [vmem:[#allocation11 + $0x8] sm:$0xff] %v69_v20  ;;  %p281_p12 = scmp.ne.s32.totalorder %s126_s23, %s280_s24  ;;  %p286_p0 = scmp.lt.s32.totalorder %s280_s24, %s280_s24 }
  0x5d   :  { %p287_p1 = por %p286_p0, %p285_p13 }
  0x5f   :  { %p288_p2 = pnand %p287_p1, %p281_p12 }
  0x61   :  { %291 = shalt.err (!%p288_p2)
}
  0x62   :  { %s292_s30 = scalar_lea.hbm %s505_s5, 256 }
  0x63   :  { %p293_p3 = scmp.ne.s32.totalorder %s505_s5, %s292_s30  ;;  %p296_p4 = scmp.lt.u32.totalorder %s292_s30, %s505_s5 }
  0x65   :  { %p298_p5 = pnand %p296_p4, %p293_p3 }
  0x67   :  { %301 = shalt.err (!%p298_p5)
}
  0x68   :  { %131 = dma.vmem_to_hbm [thread:$0]  %s126_s23, 256, %s505_s5, [#allocation12], %s313_s11, %s313_s11, %s314_s12  }
  0x69   :  { %306 = dma.done.wait [#allocation4], 256  }
  0x6a   :  { %307 = vsyncadd [#allocation4], 4294967040 }
  0x6b   :  { %308 = dma.done.wait [#allocation9], 512  }
  0x6c   :  { %309 = vsyncadd [#allocation9], 4294966784 }
  0x6d   :  { %310 = dma.done.wait [#allocation12], 256  }
  0x6e   :  { %311 = vsyncadd [#allocation12], 4294967040 }
  0x6f   :  { %152 = vsyncpa [#allocation3], 1 }
  0x70   :  { %153 = vsyncpa [#allocation6], 1 }
  0x71   :  { %154 = vsyncpa [#allocation4], 1 }
  0x72   :  { %155 = vsyncpa [#allocation9], 1 }
  0x73   :  { %156 = vsyncpa [#allocation12], 1 }

// kernel: tpu_custom_call.1
= control target key start
LH: loop header
LB: loop body
LE: loop exit
PB: predicated region body
PF: predicated region fallthrough
CT: control target
= control target key end

     0   :  { %13 = vsyncpa [#allocation3], 0  ;;  %s644_s0 = inlined_call_operand.hbm [shape: f32[16,128], index: 0, kind: input, shape index: {}]   ;;  %s645_s1 = inlined_call_operand.hbm [shape: f32[16,128], index: 1, kind: input, shape index: {}]   ;;  %s646_s2 = inlined_call_operand.hbm [shape: f32[16,128], index: 2, kind: output, shape index: {0}]   ;;  %s647_s3 = inlined_call_operand.hbm [shape: f32[16,128], index: 3, kind: output, shape index: {1}]   ;;  %s648_s4 = inlined_call_operand.hbm [shape: f32[16,128], index: 4, kind: output, shape index: {2}]   ;;  %s649_s5 = inlined_call_operand.hbm [shape: f32[16,128], index: 5, kind: output, shape index: {3}]   ;;  %s650_s6 = inlined_call_operand.hbm [shape: s8[16,128], index: 6, kind: output, shape index: {4}]   ;;  %s651_s7 = inlined_call_operand.hbm [shape: s8[16,128], index: 7, kind: output, shape index: {5}]  }
   0x1   :  { %14 = vsyncpa [#allocation6], 0 }
   0x2   :  { %15 = vsyncpa [#allocation4], 0 }
   0x3   :  { %16 = vsyncpa [#allocation9], 0 }
   0x4   :  { %17 = vsyncpa [#allocation12], 0 }
   0x5   :  { %18 = vsyncpa [#allocation15], 0  ;;  %s402_s24 = smov [#allocation2]   ;;  %s214_s28 = scalar_lea.hbm %s644_s0, 256 }
   0x6   :  { %s24_s25 = sshll.u32 %s402_s24, 4  ;;  %p215_p0 = scmp.ne.s32.totalorder %s644_s0, %s214_s28  ;;  %s25_s25 = int_to_ptr.vmem [resolvable:$true] %s24_s25 }
   0x7   :  { %p218_p1 = scmp.lt.u32.totalorder %s214_s28, %s644_s0 }
   0x9   :  { %p220_p2 = pnand %p218_p1, %p215_p0 }
   0xb   :  { %223 = shalt.err (!%p220_p2)
}
   0xc   :  { %s224_s10 = scalar_lea.vmem %s25_s25, 256  ;;  %p229_p4 = scmp.lt.s32.totalorder %s25_s25, %s25_s25 }
   0xd   :  { %p225_p3 = scmp.ne.s32.totalorder %s25_s25, %s224_s10  ;;  %p230_p5 = scmp.lt.s32.totalorder %s224_s10, %s224_s10 }
   0xf   :  { %p231_p6 = por %p230_p5, %p229_p4 }
  0x11   :  { %p232_p7 = pnand %p231_p6, %p225_p3 }
  0x13   :  { %235 = shalt.err (!%p232_p7)
}
  0x14   :  { %s403_s11 = smov 128   ;;  %s404_s12 = smov 8  }
  0x15   :  { %30 = dma.hbm_to_vmem [thread:$0]  %s644_s0, 256, %s25_s25, [#allocation3], %s403_s11, %s403_s11, %s404_s12  }
  0x16   :  { %s405_s15 = smov [#allocation5]   ;;  %s236_s19 = scalar_lea.hbm %s645_s1, 256 }
  0x17   :  { %s36_s16 = sshll.u32 %s405_s15, 4  ;;  %p237_p8 = scmp.ne.s32.totalorder %s645_s1, %s236_s19  ;;  %s37_s16 = int_to_ptr.vmem [resolvable:$true] %s36_s16 }
  0x18   :  { %p240_p9 = scmp.lt.u32.totalorder %s236_s19, %s645_s1 }
  0x1a   :  { %p242_p10 = pnand %p240_p9, %p237_p8 }
  0x1c   :  { %245 = shalt.err (!%p242_p10)
}
  0x1d   :  { %s246_s24 = scalar_lea.vmem %s37_s16, 256  ;;  %p251_p12 = scmp.lt.s32.totalorder %s37_s16, %s37_s16 }
  0x1e   :  { %p247_p11 = scmp.ne.s32.totalorder %s37_s16, %s246_s24  ;;  %p252_p13 = scmp.lt.s32.totalorder %s246_s24, %s246_s24 }
  0x20   :  { %p253_p0 = por %p252_p13, %p251_p12 }
  0x22   :  { %p254_p1 = pnand %p253_p0, %p247_p11 }
  0x24   :  { %257 = shalt.err (!%p254_p1)
}
  0x25   :  { %42 = dma.hbm_to_vmem [thread:$0]  %s645_s1, 256, %s37_s16, [#allocation6], %s403_s11, %s403_s11, %s404_s12  }
  0x26   :  { %390 = dma.done.wait [#allocation3], 256  }
  0x27   :  { %391 = vsyncadd [#allocation3], 4294967040 }
  0x28   :  { %392 = dma.done.wait [#allocation6], 256  }
  0x29   :  { %393 = vsyncadd [#allocation6], 4294967040  ;;  %s406_s26 = smov [#allocation8]   ;;  %v485_v0 = vld [vmem:[#allocation2] sm:$0xff]  ;;  %v53_v1 = vld [vmem:[#allocation5] sm:$0xff]  ;;  %s407_s28 = smov [#allocation7]  }
  0x2a   :  { %s118_s27 = sshll.u32 %s406_s26, 4  ;;  %v487_v2 = vld [vmem:[#allocation2 + $0x8] sm:$0xff]  ;;  %s106_s29 = sshll.u32 %s407_s28, 4  ;;  %v59_v3 = vsub.f32 %v485_v0, %v53_v1  ;;  %v54_v4 = vld [vmem:[#allocation5 + $0x8] sm:$0xff]  ;;  %v67_v5 = vadd.f32 1e-05, %v53_v1  ;;  %v55_v6 = vadd.f32 %v53_v1, %v485_v0  ;;  %v63_v7 = vmul.f32 %v53_v1, %v485_v0  ;;  %s495_s27 = int_to_ptr.vmem [resolvable:$true] %s118_s27  ;;  %s500_s29 = int_to_ptr.vmem [resolvable:$true] %s106_s29 }
  0x2b   :  { %s408_s1 = smov [#allocation10]   ;;  %v60_v8 = vsub.f32 %v487_v2, %v54_v4  ;;  %v68_v9 = vadd.f32 1e-05, %v54_v4  ;;  %v56_v10 = vadd.f32 %v54_v4, %v487_v2  ;;  %v64_v11 = vmul.f32 %v54_v4, %v487_v2  ;;  %s258_s8 = scalar_lea.vmem %s495_s27, 256 }
  0x2c   :  { %s130_s30 = sshll.u32 %s408_s1, 4  ;;  %61 = vst [vmem:[#allocation8] sm:$0xff] %v59_v3  ;;  %210 = vrcp.f32 %v67_v5  ;;  %57 = vst [vmem:[#allocation7] sm:$0xff] %v55_v6  ;;  %vm75_vm0 = vcmp.gt.f32.partialorder %v485_v0, %v53_v1  ;;  %vm76_vm1 = vcmp.gt.f32.partialorder %v487_v2, %v54_v4  ;;  %vm88_vm2 = vcmp.lt.f32.partialorder %v485_v0, %v53_v1  ;;  %p259_p2 = scmp.ne.s32.totalorder %s495_s27, %s258_s8  ;;  %s507_s30 = int_to_ptr.vmem [resolvable:$true] %s130_s30 }
  0x2d   :  { %65 = vst [vmem:[#allocation10] sm:$0xff] %v63_v7  ;;  %62 = vst [vmem:[#allocation8 + $0x8] sm:$0xff] %v60_v8  ;;  %212 = vrcp.f32 %v68_v9  ;;  %vm89_vm4 = vcmp.lt.f32.partialorder %v487_v2, %v54_v4  ;;  %p263_p3 = scmp.lt.s32.totalorder %s495_s27, %s495_s27  ;;  %p264_p4 = scmp.lt.s32.totalorder %s258_s8, %s258_s8 }
  0x2e   :  { %58 = vst [vmem:[#allocation7 + $0x8] sm:$0xff] %v56_v10  ;;  %66 = vst [vmem:[#allocation10 + $0x8] sm:$0xff] %v64_v11 }
  0x2f   :  { %vm502_vm3 = vmpackc.low %vm76_vm1, %vm75_vm0  ;;  %p265_p5 = por %p264_p4, %p263_p3 }
  0x30   :  { %vm78_vm5 = vmpackc.even %vm502_vm3, %vm502_vm3 }
  0x31   :  { %p266_p6 = pnand %p265_p5, %p259_p2 }
  0x33   :  { %269 = shalt.err (!%p266_p6)
}
  0x34   :  { %s270_s13 = scalar_lea.hbm %s647_s3, 256 }
  0x35   :  { %p271_p7 = scmp.ne.s32.totalorder %s647_s3, %s270_s13  ;;  %p274_p8 = scmp.lt.u32.totalorder %s270_s13, %s647_s3 }
  0x37   :  { %p276_p9 = pnand %p274_p8, %p271_p7 }
  0x39   :  { %279 = shalt.err (!%p276_p9)
}
  0x3a   :  { %124 = dma.vmem_to_hbm [thread:$0]  %s495_s27, 256, %s647_s3, [#allocation9], %s403_s11, %s403_s11, %s404_s12   ;;  %v409_v13 = vmov 0   ;;  %vm536_vm6 = vmpackc.low %vm89_vm4, %vm88_vm2 }
  0x3b   :  { %v79_v14 = vsel %vm78_vm5, 16843009, %v409_v13  ;;  %s280_s20 = scalar_lea.vmem %s500_s29, 256  ;;  %p285_p11 = scmp.lt.s32.totalorder %s500_s29, %s500_s29 }
  0x3c   :  { %p281_p10 = scmp.ne.s32.totalorder %s500_s29, %s280_s20  ;;  %p286_p12 = scmp.lt.s32.totalorder %s280_s20, %s280_s20 }
  0x3e   :  { %p287_p13 = por %p286_p12, %p285_p11 }
  0x40   :  { %p288_p0 = pnand %p287_p13, %p281_p10 }
  0x42   :  { %291 = shalt.err (!%p288_p0)
}
  0x43   :  { %s292_s22 = scalar_lea.hbm %s646_s2, 256 }
  0x44   :  { %p293_p1 = scmp.ne.s32.totalorder %s646_s2, %s292_s22  ;;  %p296_p2 = scmp.lt.u32.totalorder %s292_s22, %s646_s2 }
  0x46   :  { %p298_p3 = pnand %p296_p2, %p293_p1 }
  0x48   :  { %301 = shalt.err (!%p298_p3)
}
  0x49   :  { %112 = dma.vmem_to_hbm [thread:$0]  %s500_s29, 256, %s646_s2, [#allocation4], %s403_s11, %s403_s11, %s404_s12   ;;  %v80_v16 = vunpack.c.0.s8 %v79_v14  ;;  %v81_v17 = vunpack.c.1.s8 %v79_v14  ;;  %vm91_vm7 = vmpackc.even %vm536_vm6, %vm536_vm6 }
  0x4a   :  { %s302_s28 = scalar_lea.vmem %s507_s30, 256  ;;  %p307_p5 = scmp.lt.s32.totalorder %s507_s30, %s507_s30 }
  0x4b   :  { %p303_p4 = scmp.ne.s32.totalorder %s507_s30, %s302_s28  ;;  %p308_p6 = scmp.lt.s32.totalorder %s302_s28, %s302_s28 }
  0x4d   :  { %p309_p7 = por %p308_p6, %p307_p5 }
  0x4f   :  { %p310_p8 = pnand %p309_p7, %p303_p4 }
  0x51   :  { %313 = shalt.err (!%p310_p8)
}
  0x52   :  { %s314_s9 = scalar_lea.hbm %s648_s4, 256 }
  0x53   :  { %p315_p9 = scmp.ne.s32.totalorder %s648_s4, %s314_s9  ;;  %p318_p10 = scmp.lt.u32.totalorder %s314_s9, %s648_s4 }
  0x55   :  { %p320_p11 = pnand %p318_p10, %p315_p9 }
  0x57   :  { %323 = shalt.err (!%p320_p11)
}
  0x58   :  { %136 = dma.vmem_to_hbm [thread:$0]  %s507_s30, 256, %s648_s4, [#allocation9], %s403_s11, %s403_s11, %s404_s12   ;;  %v92_v18 = vsel %vm91_vm7, 16843009, %v409_v13  ;;  %v82_v19 = vpack.c.b16 %v80_v16, %v80_v16  ;;  %v84_v20 = vpack.c.b16 %v81_v17, %v81_v17  ;;  %v211_v27 = vpop.eup %210 }
  0x59   :  { %v93_v21 = vunpack.c.0.s8 %v92_v18  ;;  %v94_v22 = vunpack.c.1.s8 %v92_v18  ;;  %s410_s16 = smov [#allocation14]   ;;  %s411_s18 = smov [#allocation11]   ;;  %v213_v30 = vpop.eup %212  ;;  %v70_v31 = vmul.f32 %v211_v27, %v485_v0 }
  0x5a   :  { %s166_s17 = sshll.u32 %s410_s16, 4  ;;  %v83_v23 = vpack.c.b8 %v82_v19, %v82_v19  ;;  %v85_v24 = vpack.c.b8 %v84_v20, %v84_v20  ;;  %s142_s19 = sshll.u32 %s411_s18, 4  ;;  %v72_v32 = vmul.f32 %v213_v30, %v487_v2  ;;  %s167_s17 = int_to_ptr.vmem [resolvable:$true] %s166_s17  ;;  %s585_s19 = int_to_ptr.vmem [resolvable:$true] %s142_s19 }
  0x5b   :  { %v95_v25 = vpack.c.b16 %v93_v21, %v93_v21  ;;  %v97_v26 = vpack.c.b16 %v94_v22, %v94_v22  ;;  %s412_s20 = smov [#allocation13]   ;;  %73 = vst [vmem:[#allocation11] sm:$0xff] %v70_v31  ;;  %s324_s4 = scalar_lea.vmem %s167_s17, 64 }
  0x5c   :  { %s154_s21 = sshll.u32 %s412_s20, 4  ;;  %86 = vst [vmem:[#allocation13] sm:$0x3] %v83_v23  ;;  %87 = vst [vmem:[#allocation13 + $0x2] sm:$0x3] %v85_v24  ;;  %p325_p12 = scmp.ne.s32.totalorder %s167_s17, %s324_s4  ;;  %s587_s21 = int_to_ptr.vmem [resolvable:$true] %s154_s21 }
  0x5d   :  { %v96_v28 = vpack.c.b8 %v95_v25, %v95_v25  ;;  %v98_v29 = vpack.c.b8 %v97_v26, %v97_v26  ;;  %p329_p13 = scmp.lt.s32.totalorder %s167_s17, %s167_s17  ;;  %p330_p0 = scmp.lt.s32.totalorder %s324_s4, %s324_s4 }
  0x5f   :  { %99 = vst [vmem:[#allocation14] sm:$0x3] %v96_v28  ;;  %100 = vst [vmem:[#allocation14 + $0x2] sm:$0x3] %v98_v29  ;;  %p331_p1 = por %p330_p0, %p329_p13 }
  0x61   :  { %p332_p2 = pnand %p331_p1, %p325_p12 }
  0x63   :  { %335 = shalt.err (!%p332_p2)
}
  0x64   :  { %s336_s22 = scalar_lea.hbm %s651_s7, 64 }
  0x65   :  { %p337_p3 = scmp.ne.s32.totalorder %s651_s7, %s336_s22  ;;  %p340_p4 = scmp.lt.u32.totalorder %s336_s22, %s651_s7 }
  0x67   :  { %p342_p5 = pnand %p340_p4, %p337_p3 }
  0x69   :  { %345 = shalt.err (!%p342_p5)
}
  0x6a   :  { %s413_s26 = smov 32   ;;  %s414_s27 = smov 2   ;;  %74 = vst [vmem:[#allocation11 + $0x8] sm:$0xff] %v72_v32 }
  0x6b   :  { %172 = dma.vmem_to_hbm [thread:$0]  %s167_s17, 64, %s651_s7, [#allocation15], %s413_s26, %s413_s26, %s414_s27  }
  0x6c   :  { %s346_s8 = scalar_lea.vmem %s585_s19, 256  ;;  %p351_p7 = scmp.lt.s32.totalorder %s585_s19, %s585_s19 }
  0x6d   :  { %p347_p6 = scmp.ne.s32.totalorder %s585_s19, %s346_s8  ;;  %p352_p8 = scmp.lt.s32.totalorder %s346_s8, %s346_s8 }
  0x6f   :  { %p353_p9 = por %p352_p8, %p351_p7 }
  0x71   :  { %p354_p10 = pnand %p353_p9, %p347_p6 }
  0x73   :  { %357 = shalt.err (!%p354_p10)
}
  0x74   :  { %s358_s2 = scalar_lea.hbm %s649_s5, 256 }
  0x75   :  { %p359_p11 = scmp.ne.s32.totalorder %s649_s5, %s358_s2  ;;  %p362_p12 = scmp.lt.u32.totalorder %s358_s2, %s649_s5 }
  0x77   :  { %p364_p13 = pnand %p362_p12, %p359_p11 }
  0x79   :  { %367 = shalt.err (!%p364_p13)
}
  0x7a   :  { %148 = dma.vmem_to_hbm [thread:$0]  %s585_s19, 256, %s649_s5, [#allocation12], %s403_s11, %s403_s11, %s404_s12  }
  0x7b   :  { %s368_s17 = scalar_lea.vmem %s587_s21, 64  ;;  %p373_p1 = scmp.lt.s32.totalorder %s587_s21, %s587_s21 }
  0x7c   :  { %p369_p0 = scmp.ne.s32.totalorder %s587_s21, %s368_s17  ;;  %p374_p2 = scmp.lt.s32.totalorder %s368_s17, %s368_s17 }
  0x7e   :  { %p375_p3 = por %p374_p2, %p373_p1 }
  0x80   :  { %p376_p4 = pnand %p375_p3, %p369_p0 }
  0x82   :  { %379 = shalt.err (!%p376_p4)
}
  0x83   :  { %s380_s4 = scalar_lea.hbm %s650_s6, 64 }
  0x84   :  { %p381_p5 = scmp.ne.s32.totalorder %s650_s6, %s380_s4  ;;  %p384_p6 = scmp.lt.u32.totalorder %s380_s4, %s650_s6 }
  0x86   :  { %p386_p7 = pnand %p384_p6, %p381_p5 }
  0x88   :  { %389 = shalt.err (!%p386_p7)
}
  0x89   :  { %160 = dma.vmem_to_hbm [thread:$0]  %s587_s21, 64, %s650_s6, [#allocation12], %s413_s26, %s413_s26, %s414_s27  }
  0x8a   :  { %394 = dma.done.wait [#allocation4], 256  }
  0x8b   :  { %395 = vsyncadd [#allocation4], 4294967040 }
  0x8c   :  { %396 = dma.done.wait [#allocation9], 512  }
  0x8d   :  { %397 = vsyncadd [#allocation9], 4294966784 }
  0x8e   :  { %398 = dma.done.wait [#allocation12], 320  }
  0x8f   :  { %399 = vsyncadd [#allocation12], 4294966976 }
  0x90   :  { %400 = dma.done.wait [#allocation15], 64  }
  0x91   :  { %401 = vsyncadd [#allocation15], 4294967232 }
  0x92   :  { %191 = vsyncpa [#allocation3], 1 }
  0x93   :  { %192 = vsyncpa [#allocation6], 1 }
  0x94   :  { %193 = vsyncpa [#allocation4], 1 }
  0x95   :  { %194 = vsyncpa [#allocation9], 1 }
  0x96   :  { %195 = vsyncpa [#allocation12], 1 }
  0x97   :  { %196 = vsyncpa [#allocation15], 1 }

</bundles_post_ra>
